<compile_context>
chip_gen: v5e
topology: v5e:2x2
jax: 0.10.0
libtpu: 0.0.40
codegen_flags: <defaults>
</compile_context>

<pallas_src>
import jax
import jax.numpy as jnp
import numpy as np
from jax.experimental import pallas as pl
from jax.experimental.pallas import tpu as pltpu


def _householder_kernel(trig_ref, z_ref, out_ref):
    # trig_ref: (4, ceff, 1)  rows = sin(t/2), cos(t/2), sin(t), cos(t)
    # z_ref / out_ref: (bn, 2, ceff, hw_tile)
    x = z_ref[:, 0, :, :]              # (bn, ceff, hw_tile)
    y = z_ref[:, 1, :, :]

    sin_half = trig_ref[0]             # (ceff, 1) -> lane/batch broadcast
    cos_half = trig_ref[1]
    sin_t = trig_ref[2]
    cos_t = trig_ref[3]

    selector = x * sin_half - y * cos_half
    a2 = x * cos_t + y * sin_t
    b2 = x * sin_t - y * cos_t

    keep = selector <= 0.0             # exclusive with (selector > 0)
    out_ref[:, 0, :, :] = jnp.where(keep, x, a2)
    out_ref[:, 1, :, :] = jnp.where(keep, y, b2)


def _pick_tiles(n, ceff, hw_pad, itemsize, budget_bytes):
    """Choose (bn, hw_tile): lane tile is the largest multiple of 128 dividing
    hw_pad within budget; bn is the largest divisor of n that keeps one block
    (bn, 2, ceff, hw_tile) under budget_bytes."""
    assert hw_pad % 128 == 0
    per_lane_bytes = 2 * ceff * itemsize
    max_tile = max(128, (budget_bytes // per_lane_bytes) // 128 * 128)
    hw_tile = min(hw_pad, max_tile)
    while hw_pad % hw_tile != 0:
        hw_tile -= 128

    block_bytes_one = 2 * ceff * hw_tile * itemsize
    bn = 1
    for d in range(1, n + 1):
        if n % d == 0 and d * block_bytes_one <= budget_bytes:
            bn = d
    return bn, hw_tile


def householder_forward(z, theta, *, target_block_bytes=2 << 20):
    """z: (N, C, H, W), theta: (1, C//2, 1, 1)."""
    N, C, H, W = z.shape
    assert C % 2 == 0
    ceff = C // 2
    hw = H * W

    # Free reshape: channel halves become an explicit axis of size 2 so the
    # kernel reads/writes both halves of one buffer (no split / concat).
    z4 = z.reshape(N, 2, ceff, hw)

    # Lane-dense last axis: pad flattened spatial up to a multiple of 128.
    hw_pad = ((hw + 127) // 128) * 128
    if hw_pad != hw:
        z4 = jnp.pad(z4, ((0, 0), (0, 0), (0, 0), (0, hw_pad - hw)))

    bn, hw_tile = _pick_tiles(N, ceff, hw_pad, z.dtype.itemsize,
                              target_block_bytes)
    grid = (N // bn, hw_pad // hw_tile)

    # Grid-invariant trig: computed once here, not on the EUP per grid step.
    th = theta.reshape(ceff).astype(z.dtype)
    trig = jnp.stack(
        [jnp.sin(0.5 * th), jnp.cos(0.5 * th), jnp.sin(th), jnp.cos(th)]
    )[:, :, None]                                     # (4, ceff, 1)

    data_spec = pl.BlockSpec((bn, 2, ceff, hw_tile), lambda n, s: (n, 0, 0, s))
    trig_spec = pl.BlockSpec((4, ceff, 1), lambda n, s: (0, 0, 0))

    out = pl.pallas_call(
        _householder_kernel,
        grid=grid,
        in_specs=[trig_spec, data_spec],
        out_specs=data_spec,
        out_shape=jax.ShapeDtypeStruct((N, 2, ceff, hw_pad), z.dtype),
        compiler_params=pltpu.CompilerParams(
            dimension_semantics=("parallel", "parallel")
        ),
    )(trig, z4)

    if hw_pad != hw:
        out = out[:, :, :, :hw]
    # (N, 2, ceff, hw) flattens exactly like (N, C, H, W) -> free reshape.
    return out.reshape(N, C, H, W)


def householder_reference(z, theta):
    """Pure-JAX reference mirroring the PyTorch forward."""
    C = z.shape[1]
    x, y = z[:, : C // 2], z[:, C // 2:]
    selector = x * jnp.sin(0.5 * theta) - y * jnp.cos(0.5 * theta)
    a2 = x * jnp.cos(theta) + y * jnp.sin(theta)
    b2 = x * jnp.sin(theta) - y * jnp.cos(theta)
    a = jnp.where(selector <= 0, x, a2)
    b = jnp.where(selector <= 0, y, b2)
    return jnp.concatenate([a, b], axis=1)


if __name__ == "__main__":
    N, C, H, W = 2, 4, 16, 16
    key = jax.random.PRNGKey(0)
    z = jax.random.normal(key, (N, C, H, W), dtype=jnp.float32)

    # Deterministic parameter init matching the module's __init__:
    # theta = 0.5 * pi * ones(1, C//2, 1, 1)
    theta = 0.5 * np.pi * jnp.ones((1, C // 2, 1, 1), dtype=jnp.float32)

    out = jax.block_until_ready(householder_forward(z, theta))
    ref = householder_reference(z, theta)
    np.testing.assert_allclose(np.asarray(out), np.asarray(ref),
                               rtol=1e-6, atol=1e-6)
    print("KERNEL_OK")
</pallas_src>

<mosaic_0001>
module attributes {stable_mosaic.version = 11 : i64} {
  func.func @_householder_kernel(%arg0: i32, %arg1: i32, %arg2: memref<4x2x1xf32, #tpu.memory_space<vmem>>, %arg3: memref<2x2x2x256xf32, #tpu.memory_space<vmem>>, %arg4: memref<2x2x2x256xf32, #tpu.memory_space<vmem>>) attributes {dimension_semantics = [#tpu.dimension_semantics<parallel>, #tpu.dimension_semantics<parallel>], iteration_bounds = array<i64: 1, 1>, scalar_prefetch = 0 : i64, scratch_operands = 0 : i64, tpu.core_type = #tpu.core_type<tc>, window_params = [{pipeline_mode = #tpu.pipeline_mode<synchronous>, transform_indices = @transform_0, window_bounds = array<i64: 4, 2, 1>}, {transform_indices = @transform_1, window_bounds = array<i64: 2, 2, 2, 256>}, {transform_indices = @transform_2, window_bounds = array<i64: 2, 2, 2, 256>}]} {
    %c0 = arith.constant 0 : index
    %c0_0 = arith.constant 0 : index
    %c0_1 = arith.constant 0 : index
    %c0_2 = arith.constant 0 : index
    %0 = vector.load %arg3[%c0, %c0_0, %c0_1, %c0_2] : memref<2x2x2x256xf32, #tpu.memory_space<vmem>>, vector<2x1x2x256xf32>
    %1 = vector.shape_cast %0 : vector<2x1x2x256xf32> to vector<2x2x256xf32>
    %c0_3 = arith.constant 0 : index
    %c1 = arith.constant 1 : index
    %c0_4 = arith.constant 0 : index
    %c0_5 = arith.constant 0 : index
    %2 = vector.load %arg3[%c0_3, %c1, %c0_4, %c0_5] : memref<2x2x2x256xf32, #tpu.memory_space<vmem>>, vector<2x1x2x256xf32>
    %3 = vector.shape_cast %2 : vector<2x1x2x256xf32> to vector<2x2x256xf32>
    %c0_6 = arith.constant 0 : index
    %c0_7 = arith.constant 0 : index
    %c0_8 = arith.constant 0 : index
    %4 = vector.load %arg2[%c0_6, %c0_7, %c0_8] : memref<4x2x1xf32, #tpu.memory_space<vmem>>, vector<1x2x1xf32>
    %5 = vector.shape_cast %4 : vector<1x2x1xf32> to vector<2x1xf32>
    %c1_9 = arith.constant 1 : index
    %c0_10 = arith.constant 0 : index
    %c0_11 = arith.constant 0 : index
    %6 = vector.load %arg2[%c1_9, %c0_10, %c0_11] : memref<4x2x1xf32, #tpu.memory_space<vmem>>, vector<1x2x1xf32>
    %7 = vector.shape_cast %6 : vector<1x2x1xf32> to vector<2x1xf32>
    %c2 = arith.constant 2 : index
    %c0_12 = arith.constant 0 : index
    %c0_13 = arith.constant 0 : index
    %8 = vector.load %arg2[%c2, %c0_12, %c0_13] : memref<4x2x1xf32, #tpu.memory_space<vmem>>, vector<1x2x1xf32>
    %9 = vector.shape_cast %8 : vector<1x2x1xf32> to vector<2x1xf32>
    %c3 = arith.constant 3 : index
    %c0_14 = arith.constant 0 : index
    %c0_15 = arith.constant 0 : index
    %10 = vector.load %arg2[%c3, %c0_14, %c0_15] : memref<4x2x1xf32, #tpu.memory_space<vmem>>, vector<1x2x1xf32>
    %11 = vector.shape_cast %10 : vector<1x2x1xf32> to vector<2x1xf32>
    %12 = vector.shape_cast %5 : vector<2x1xf32> to vector<1x2x1xf32>
    %13 = vector.broadcast %12 : vector<1x2x1xf32> to vector<2x2x256xf32>
    %14 = arith.mulf %1, %13 : vector<2x2x256xf32>
    %15 = vector.shape_cast %7 : vector<2x1xf32> to vector<1x2x1xf32>
    %16 = vector.broadcast %15 : vector<1x2x1xf32> to vector<2x2x256xf32>
    %17 = arith.mulf %3, %16 : vector<2x2x256xf32>
    %18 = arith.subf %14, %17 : vector<2x2x256xf32>
    %19 = vector.shape_cast %11 : vector<2x1xf32> to vector<1x2x1xf32>
    %20 = vector.broadcast %19 : vector<1x2x1xf32> to vector<2x2x256xf32>
    %21 = arith.mulf %1, %20 : vector<2x2x256xf32>
    %22 = vector.shape_cast %9 : vector<2x1xf32> to vector<1x2x1xf32>
    %23 = vector.broadcast %22 : vector<1x2x1xf32> to vector<2x2x256xf32>
    %24 = arith.mulf %3, %23 : vector<2x2x256xf32>
    %25 = arith.addf %21, %24 : vector<2x2x256xf32>
    %26 = vector.shape_cast %9 : vector<2x1xf32> to vector<1x2x1xf32>
    %27 = vector.broadcast %26 : vector<1x2x1xf32> to vector<2x2x256xf32>
    %28 = arith.mulf %1, %27 : vector<2x2x256xf32>
    %29 = vector.shape_cast %11 : vector<2x1xf32> to vector<1x2x1xf32>
    %30 = vector.broadcast %29 : vector<1x2x1xf32> to vector<2x2x256xf32>
    %31 = arith.mulf %3, %30 : vector<2x2x256xf32>
    %32 = arith.subf %28, %31 : vector<2x2x256xf32>
    %cst = arith.constant 0.000000e+00 : f32
    %33 = vector.broadcast %cst : f32 to vector<2x2x256xf32>
    %34 = arith.cmpf ole, %18, %33 : vector<2x2x256xf32>
    %35 = arith.select %34, %1, %25 : vector<2x2x256xi1>, vector<2x2x256xf32>
    %c0_16 = arith.constant 0 : index
    %c0_17 = arith.constant 0 : index
    %c0_18 = arith.constant 0 : index
    %c0_19 = arith.constant 0 : index
    %36 = vector.load %arg4[%c0_16, %c0_17, %c0_18, %c0_19] : memref<2x2x2x256xf32, #tpu.memory_space<vmem>>, vector<2x1x2x256xf32>
    %37 = vector.shape_cast %36 : vector<2x1x2x256xf32> to vector<2x2x256xf32>
    %38 = vector.shape_cast %35 : vector<2x2x256xf32> to vector<2x1x2x256xf32>
    tpu.vector_store %arg4[%c0_16, %c0_17, %c0_18, %c0_19], %38 {strides = array<i32>} : memref<2x2x2x256xf32, #tpu.memory_space<vmem>>, vector<2x1x2x256xf32>,
    %39 = arith.select %34, %3, %32 : vector<2x2x256xi1>, vector<2x2x256xf32>
    %c0_20 = arith.constant 0 : index
    %c1_21 = arith.constant 1 : index
    %c0_22 = arith.constant 0 : index
    %c0_23 = arith.constant 0 : index
    %40 = vector.load %arg4[%c0_20, %c1_21, %c0_22, %c0_23] : memref<2x2x2x256xf32, #tpu.memory_space<vmem>>, vector<2x1x2x256xf32>
    %41 = vector.shape_cast %40 : vector<2x1x2x256xf32> to vector<2x2x256xf32>
    %42 = vector.shape_cast %39 : vector<2x2x256xf32> to vector<2x1x2x256xf32>
    tpu.vector_store %arg4[%c0_20, %c1_21, %c0_22, %c0_23], %42 {strides = array<i32>} : memref<2x2x2x256xf32, #tpu.memory_space<vmem>>, vector<2x1x2x256xf32>,
    return
  }
  func.func @transform_0(%arg0: i32, %arg1: i32) -> (i32, i32, i32) {
    %c0_i32 = arith.constant 0 : i32
    %c0_i32_0 = arith.constant 0 : i32
    %c0_i32_1 = arith.constant 0 : i32
    %c0_i32_2 = arith.constant 0 : i32
    return %c0_i32, %c0_i32_0, %c0_i32_1 : i32, i32, i32
  }
  func.func @transform_1(%arg0: i32, %arg1: i32) -> (i32, i32, i32, i32) {
    %c0_i32 = arith.constant 0 : i32
    %c0_i32_0 = arith.constant 0 : i32
    %c0_i32_1 = arith.constant 0 : i32
    return %arg0, %c0_i32, %c0_i32_0, %arg1 : i32, i32, i32, i32
  }
  func.func @transform_2(%arg0: i32, %arg1: i32) -> (i32, i32, i32, i32) {
    %c0_i32 = arith.constant 0 : i32
    %c0_i32_0 = arith.constant 0 : i32
    %c0_i32_1 = arith.constant 0 : i32
    return %arg0, %c0_i32, %c0_i32_0, %arg1 : i32, i32, i32, i32
  }
}

</mosaic_0001>

<bundles_post_ra>
// kernel: tpu_custom_call.1
= control target key start
LH: loop header
LB: loop body
LE: loop exit
PB: predicated region body
PF: predicated region fallthrough
CT: control target
= control target key end

     0   :  { %7 = vsyncpa [#allocation3], 0  ;;  %s232_s0 = inlined_call_operand.vmem [shape: f32[4,2,1], index: 0, kind: input, shape index: {}]   ;;  %s233_s1 = inlined_call_operand.hbm [shape: f32[2,2,2,256], index: 1, kind: input, shape index: {}]   ;;  %s234_s2 = inlined_call_operand.hbm [shape: f32[2,2,2,256], index: 2, kind: output, shape index: {}]  }
   0x1   :  { %8 = vsyncpa [#allocation4], 0  ;;  %s15_s11 = sshll.u32 %s233_s1, 4  ;;  %s187_s12 = smov [#allocation2]   ;;  %s16_s11 = int_to_ptr.hbm [resolvable:$true] %s15_s11 }
   0x2   :  { %s17_s13 = sshll.u32 %s187_s12, 4  ;;  %s188_s14 = smov 64   ;;  %s18_s13 = int_to_ptr.vmem [resolvable:$true] %s17_s13 }
   0x3   :  { %s189_s15 = smov 4  }
   0x4   :  { %23 = dma.hbm_to_vmem [thread:$0]  %s16_s11, 256, %s18_s13, [#allocation3], %s188_s14, %s188_s14, %s189_s15  }
   0x5   :  { %183 = dma.done.wait [#allocation3], 256  }
   0x6   :  { %184 = vsyncadd [#allocation3], 4294967040  ;;  %v190_v0 = vmov 0   ;;  %v126_v1 = vld [vmem:[%s232_s0 + $0x6] sm:$0x3]  ;;  %s111_s26 = sshll.u32 %s234_s2, 4  ;;  %s112_s26 = int_to_ptr.hbm [resolvable:$true] %s111_s26 }
   0x7   :  { %134 = vset.pattern.permute.xlu1 %v190_v0  ;;  %133 = vset.pattern.permute.xlu0 %v190_v0  ;;  %v33_v2 = vld [vmem:[%s232_s0] sm:$0x3]  ;;  %v125_v3 = vld [vmem:[%s232_s0 + $0x4] sm:$0x3]  ;;  %v124_v4 = vld [vmem:[%s232_s0 + $0x2] sm:$0x3] }
   0x8   :  { %66 = vperm.xlu1 %134, %v126_v1   ;;  %42 = vperm.xlu0 %133, %v33_v2   ;;  %v191_v5 = vmov 269488144   ;;  %v28_v11 = vld [vmem:[#allocation2] sm:$0xf]  ;;  %v29_v13 = vld [vmem:[#allocation2 + $0x8] sm:$0xf] }
   0x9   :  { %v45_v6 = vunpack.c.l.s4 %v191_v5  ;;  %v31_v14 = vld [vmem:[#allocation2 + $0x4] sm:$0xf]  ;;  %v32_v15 = vld [vmem:[#allocation2 + $0xc] sm:$0xf]  ;;  %s192_s0 = smov [#allocation5]  }
   0xa   :  { %s109_s23 = sshll.u32 %s192_s0, 4  ;;  %s110_s23 = int_to_ptr.vmem [resolvable:$true] %s109_s23 }
   0xb   :  { %v46_v9 = vunpack.c.0.s8 %v45_v6 }
  0x10   :  { %77 = vperm.xlu1 %134, %v125_v3   ;;  %53 = vperm.xlu0 %133, %v124_v4  }
  0x7a   :  { %v67_v7 = vpop.permute.xlu1 %66  ;;  %v43_v8 = vpop.permute.xlu0 %42 }
  0x7b   :  { %v71_v10 = vperm.slane %v67_v7, %v46_v9  ;;  %v47_v12 = vperm.slane %v43_v8, %v46_v9 }
  0x7d   :  { %v49_v20 = vmul.f32 %v47_v12, %v28_v11  ;;  %v50_v21 = vmul.f32 %v47_v12, %v29_v13  ;;  %v90_v22 = vmul.f32 %v71_v10, %v31_v14  ;;  %v91_v23 = vmul.f32 %v71_v10, %v32_v15 }
  0x7e   :  { %v73_v28 = vmul.f32 %v71_v10, %v28_v11  ;;  %v74_v29 = vmul.f32 %v71_v10, %v29_v13 }
  0x82   :  { %v78_v16 = vpop.permute.xlu1 %77  ;;  %v54_v17 = vpop.permute.xlu0 %53 }
  0x83   :  { %v82_v18 = vperm.slane %v78_v16, %v46_v9  ;;  %v58_v19 = vperm.slane %v54_v17, %v46_v9 }
  0x85   :  { %v88_v24 = vmul.f32 %v82_v18, %v28_v11  ;;  %v89_v25 = vmul.f32 %v82_v18, %v29_v13  ;;  %v60_v26 = vmul.f32 %v58_v19, %v31_v14  ;;  %v61_v27 = vmul.f32 %v58_v19, %v32_v15 }
  0x86   :  { %v84_v30 = vmul.f32 %v82_v18, %v31_v14  ;;  %v85_v31 = vmul.f32 %v82_v18, %v32_v15 }
  0x87   :  { %v62_v32 = vsub.f32 %v49_v20, %v60_v26  ;;  %v63_v33 = vsub.f32 %v50_v21, %v61_v27  ;;  %v92_v34 = vsub.f32 %v88_v24, %v90_v22  ;;  %v93_v35 = vsub.f32 %v89_v25, %v91_v23 }
  0x88   :  { %v86_v36 = vadd.f32 %v84_v30, %v73_v28  ;;  %v87_v37 = vadd.f32 %v85_v31, %v74_v29 }
  0x89   :  { %vm94_vm0 = vcmp.le.f32.partialorder %v62_v32, 0.0  ;;  %vm95_vm1 = vcmp.le.f32.partialorder %v63_v33, 0.0 }
  0x8a   :  { %v96_v38 = vsel %vm94_vm0, %v28_v11, %v86_v36  ;;  %v97_v39 = vsel %vm95_vm1, %v29_v13, %v87_v37  ;;  %v100_v40 = vsel %vm94_vm0, %v31_v14, %v92_v34  ;;  %v101_v41 = vsel %vm95_vm1, %v32_v15, %v93_v35 }
  0x8b   :  { %98 = vst [vmem:[#allocation5] sm:$0xf] %v96_v38 }
  0x8c   :  { %99 = vst [vmem:[#allocation5 + $0x8] sm:$0xf] %v97_v39 }
  0x8d   :  { %103 = vst [vmem:[#allocation5 + $0x4] sm:$0xf] %v100_v40 }
  0x8e   :  { %104 = vst [vmem:[#allocation5 + $0xc] sm:$0xf] %v101_v41 }
  0x8f   :  { %117 = dma.vmem_to_hbm [thread:$0]  %s110_s23, 256, %s112_s26, [#allocation4], %s188_s14, %s188_s14, %s189_s15  }
  0x90   :  { %185 = dma.done.wait [#allocation4], 256  }
  0x91   :  { %186 = vsyncadd [#allocation4], 4294967040 }
  0x92   :  { %122 = vsyncpa [#allocation3], 1 }
  0x93   :  { %123 = vsyncpa [#allocation4], 1 }

</bundles_post_ra>
